<compile_context>
chip_gen: v5e
topology: v5e:2x2
jax: 0.10.0
libtpu: 0.0.40
codegen_flags: <defaults>
</compile_context>

<pallas_src>
import jax
import jax.numpy as jnp
from jax.experimental import pallas as pl
from jax.experimental.pallas import tpu as pltpu


def _round_up(x, m):
    return ((x + m - 1) // m) * m


def _make_resident_kernel(mxu_dtype):
    """Fused 2-layer MLP with the whole reduction dim resident in VMEM."""

    def kernel(x_ref, w1_ref, b1_ref, w2_ref, b2_ref, o_ref):
        # Layer 1: (tile_b, K) @ (K, hidden), f32 accumulation on the MXU.
        h = jnp.dot(x_ref[...].astype(mxu_dtype), w1_ref[...],
                    preferred_element_type=jnp.float32)
        # Bias + ReLU epilogue in f32 (v5e VPU has no bf16).
        h = jnp.maximum(h + b1_ref[...], 0.0)
        # Layer 2, fused: hidden activation never leaves VMEM.
        out = jnp.dot(h.astype(mxu_dtype), w2_ref[...],
                      preferred_element_type=jnp.float32)
        o_ref[...] = (out + b2_ref[...]).astype(o_ref.dtype)

    return kernel


def _make_ktiled_kernel(mxu_dtype):
    """Fallback for very large d_in: K-tiled layer 1 with an f32 accumulator."""

    def kernel(x_ref, w1_ref, b1_ref, w2_ref, b2_ref, o_ref, acc_ref):
        k = pl.program_id(1)

        # Fold b1 into the accumulator init (saves an epilogue VPU add on the
        # critical last K step).
        @pl.when(k == 0)
        def _():
            acc_ref[...] = jnp.zeros_like(acc_ref) + b1_ref[...]

        # Layer 1 partial: (tile_b, tile_k) @ (tile_k, hidden).
        acc_ref[...] += jnp.dot(x_ref[...].astype(mxu_dtype), w1_ref[...],
                                preferred_element_type=jnp.float32)

        # Finalize on the last K step: ReLU then layer 2, fused.
        @pl.when(k == pl.num_programs(1) - 1)
        def _():
            h = jnp.maximum(acc_ref[...], 0.0)
            out = jnp.dot(h.astype(mxu_dtype), w2_ref[...],
                          preferred_element_type=jnp.float32)
            o_ref[...] = (out + b2_ref[...]).astype(o_ref.dtype)

    return kernel


def simple_2layer_mlp(xb, w1, b1, w2, b2, *, use_bf16_mxu=True,
                      tile_b=None, tile_k=None, vmem_budget_bytes=48 << 20):
    """xb: (B, C, H, W). Weights stored as (in_features, out_features).
    Returns (B, dim).  tile_k=None -> auto (W1-resident path when it fits)."""
    B = xb.shape[0]
    x2d = xb.reshape(B, -1)                 # same flattening as torch .view(B, -1)
    d_in = x2d.shape[1]
    hidden = w1.shape[1]
    d_out = w2.shape[1]

    x_dt = x2d.dtype
    w_dt = jnp.bfloat16 if use_bf16_mxu else w1.dtype
    mxu_dtype = jnp.bfloat16 if use_bf16_mxu else x_dt
    x_isz = jnp.dtype(x_dt).itemsize
    w_isz = jnp.dtype(w_dt).itemsize

    # ---- batch tiling ----------------------------------------------------
    rb = _round_up(B, 8)                    # f32 sublane multiple
    tb = 512 if tile_b is None else tile_b  # sweepable; 512 is a good default
    tb = min(_round_up(tb, 8), rb)
    if rb >= 256:
        # Keep >=2 batch tiles so v7x's two TensorCores both get work.
        tb = min(tb, _round_up((rb + 1) // 2, 8))
    padded_b = _round_up(B, tb)
    n_btiles = padded_b // tb

    # ---- reduction-dim (d_in) handling ------------------------------------
    k_full = _round_up(d_in, 128)           # lane multiple

    # VMEM estimate for the W1-resident (no K grid axis) path.
    resident_est = (
        2 * tb * k_full * x_isz             # x tile, double-buffered
        + 2 * k_full * hidden * w_isz       # resident W1
        + 2 * hidden * d_out * w_isz        # resident W2
        + 2 * 8 * (hidden + d_out) * 4      # biases (sublane-padded)
        + 2 * tb * d_out * x_isz            # out tile
        + 2 * tb * hidden * 4               # hidden activation temporaries
    )
    use_resident = (tile_k is None) and (resident_est <= vmem_budget_bytes)

    # Pre-cast weights ONCE in the wrapper (halves streamed weight traffic).
    # Do NOT pre-cast x — that would add an extra HBM round trip.
    w1_c = w1.astype(w_dt)
    w2_c = w2.astype(w_dt)
    b1_2d = b1.reshape(1, hidden).astype(jnp.float32)
    b2_2d = b2.reshape(1, d_out).astype(jnp.float32)

    if use_resident:
        padded_k = k_full
        tk = padded_k
    else:
        tk = 512 if tile_k is None else tile_k
        tk = min(_round_up(tk, 128), k_full)
        padded_k = _round_up(d_in, tk)

    # Zero-pad only when actually needed (jnp.pad writes a full HBM copy).
    if padded_b != B or padded_k != d_in:
        x_p = jnp.pad(x2d, ((0, padded_b - B), (0, padded_k - d_in)))
    else:
        x_p = x2d
    if padded_k != d_in:
        w1_c = jnp.pad(w1_c, ((0, padded_k - d_in), (0, 0)))

    # Advisory cost estimate (accounts for W1 re-reads on the K-tiled path).
    w1_reads = 1 if use_resident else n_btiles
    cost = pl.CostEstimate(
        flops=2 * B * d_in * hidden + 2 * B * hidden * d_out,
        transcendentals=0,
        bytes_accessed=int(
            padded_b * padded_k * x_isz
            + w1_reads * padded_k * hidden * w_isz
            + hidden * d_out * w_isz
            + (hidden + d_out) * 4
            + padded_b * d_out * x_isz),
    )

    cparams = pltpu.CompilerParams(
        dimension_semantics=("parallel",) if use_resident
        else ("parallel", "arbitrary"),
        vmem_limit_bytes=int(vmem_budget_bytes),
    )

    if use_resident:
        out_p = pl.pallas_call(
            _make_resident_kernel(mxu_dtype),
            out_shape=jax.ShapeDtypeStruct((padded_b, d_out), x_dt),
            grid_spec=pltpu.PrefetchScalarGridSpec(
                num_scalar_prefetch=0,
                grid=(n_btiles,),
                in_specs=[
                    # x marches over batch tiles only.
                    pl.BlockSpec((tb, padded_k), lambda i: (i, 0)),
                    # W1/b1/W2/b2: constant index maps -> VMEM-resident.
                    pl.BlockSpec((padded_k, hidden), lambda i: (0, 0)),
                    pl.BlockSpec((1, hidden), lambda i: (0, 0)),
                    pl.BlockSpec((hidden, d_out), lambda i: (0, 0)),
                    pl.BlockSpec((1, d_out), lambda i: (0, 0)),
                ],
                out_specs=pl.BlockSpec((tb, d_out), lambda i: (i, 0)),
            ),
            compiler_params=cparams,
            cost_estimate=cost,
        )(x_p, w1_c, b1_2d, w2_c, b2_2d)
    else:
        out_p = pl.pallas_call(
            _make_ktiled_kernel(mxu_dtype),
            out_shape=jax.ShapeDtypeStruct((padded_b, d_out), x_dt),
            grid_spec=pltpu.PrefetchScalarGridSpec(
                num_scalar_prefetch=0,
                grid=(n_btiles, padded_k // tk),
                in_specs=[
                    pl.BlockSpec((tb, tk), lambda i, k: (i, k)),
                    pl.BlockSpec((tk, hidden), lambda i, k: (k, 0)),
                    pl.BlockSpec((1, hidden), lambda i, k: (0, 0)),
                    pl.BlockSpec((hidden, d_out), lambda i, k: (0, 0)),
                    pl.BlockSpec((1, d_out), lambda i, k: (0, 0)),
                ],
                out_specs=pl.BlockSpec((tb, d_out), lambda i, k: (i, 0)),
                scratch_shapes=[pltpu.VMEM((tb, hidden), jnp.float32)],
            ),
            compiler_params=cparams,
            cost_estimate=cost,
        )(x_p, w1_c, b1_2d, w2_c, b2_2d)

    return out_p[:B]


def _reference(xb, w1, b1, w2, b2):
    x2d = xb.reshape(xb.shape[0], -1)
    h = jnp.maximum(x2d @ w1 + b1, 0.0)
    return h @ w2 + b2


if __name__ == "__main__":
    # Shapes consistent with the module: input (B, C, H, W) = (2, 4, 16, 16)
    # -> input_dim = 1024, hidden = 256, dim = 128.
    B, C, H, W = 2, 4, 16, 16
    input_dim = C * H * W
    hidden = 256
    dim = 128

    key = jax.random.PRNGKey(0)
    kx, k1, kb1, k2, kb2 = jax.random.split(key, 5)

    xb = jax.random.normal(kx, (B, C, H, W), dtype=jnp.float32)

    # Deterministic parameter init (uniform, nn.Linear fan-in scaling), stored
    # as (in_features, out_features) — transposed vs torch's weight layout.
    lim1 = 1.0 / jnp.sqrt(input_dim)
    lim2 = 1.0 / jnp.sqrt(hidden)
    w1 = jax.random.uniform(k1, (input_dim, hidden), jnp.float32, -lim1, lim1)
    b1 = jax.random.uniform(kb1, (hidden,), jnp.float32, -lim1, lim1)
    w2 = jax.random.uniform(k2, (hidden, dim), jnp.float32, -lim2, lim2)
    b2 = jax.random.uniform(kb2, (dim,), jnp.float32, -lim2, lim2)

    ref = _reference(xb, w1, b1, w2, b2)

    # 1) Resident path, exact numerics (f32 MXU operands).
    out_f32 = jax.block_until_ready(
        simple_2layer_mlp(xb, w1, b1, w2, b2, use_bf16_mxu=False))
    assert out_f32.shape == (B, dim), out_f32.shape
    assert jnp.allclose(out_f32, ref, atol=1e-4, rtol=1e-4), \
        "resident f32 path mismatch vs reference"

    # 2) Resident path, performance numerics (bf16 MXU, f32 accumulation).
    out_bf16 = jax.block_until_ready(simple_2layer_mlp(xb, w1, b1, w2, b2))
    assert out_bf16.shape == (B, dim), out_bf16.shape
    assert jnp.allclose(out_bf16, ref, atol=5e-2, rtol=5e-2), \
        "resident bf16-MXU path mismatch vs reference"

    # 3) Forced K-tiled fallback path, exact numerics (checks the accumulator
    #    + b1-folding logic bit-for-bit semantics).
    out_kt_f32 = jax.block_until_ready(
        simple_2layer_mlp(xb, w1, b1, w2, b2, use_bf16_mxu=False, tile_k=256))
    assert jnp.allclose(out_kt_f32, ref, atol=1e-4, rtol=1e-4), \
        "K-tiled f32 path mismatch vs reference"

    # 4) Forced K-tiled fallback path, bf16 MXU.
    out_kt_bf16 = jax.block_until_ready(
        simple_2layer_mlp(xb, w1, b1, w2, b2, tile_k=256))
    assert jnp.allclose(out_kt_bf16, ref, atol=5e-2, rtol=5e-2), \
        "K-tiled bf16 path mismatch vs reference"

    # 5) Larger batch: exercises multiple batch tiles, the >=2-tile clamp
    #    (v7x megacore) and padded-row slicing.
    B2 = 384
    xb2 = jax.random.normal(jax.random.PRNGKey(1), (B2, C, H, W), jnp.float32)
    ref2 = _reference(xb2, w1, b1, w2, b2)
    out2 = jax.block_until_ready(
        simple_2layer_mlp(xb2, w1, b1, w2, b2, use_bf16_mxu=False))
    assert out2.shape == (B2, dim), out2.shape
    assert jnp.allclose(out2, ref2, atol=1e-4, rtol=1e-4), \
        "multi-tile f32 path mismatch vs reference"

    print("KERNEL_OK")
</pallas_src>

<mosaic_0001>
module attributes {stable_mosaic.version = 11 : i64} {
  func.func @kernel(%arg0: i32, %arg1: memref<8x1024xf32, #tpu.memory_space<vmem>>, %arg2: memref<1024x256xf32, #tpu.memory_space<vmem>>, %arg3: memref<1x256xf32, #tpu.memory_space<vmem>>, %arg4: memref<256x128xf32, #tpu.memory_space<vmem>>, %arg5: memref<1x128xf32, #tpu.memory_space<vmem>>, %arg6: memref<8x128xf32, #tpu.memory_space<vmem>>) attributes {dimension_semantics = [#tpu.dimension_semantics<parallel>], iteration_bounds = array<i64: 1>, scalar_prefetch = 0 : i64, scratch_operands = 0 : i64, tpu.core_type = #tpu.core_type<tc>, window_params = [{transform_indices = @transform_0, window_bounds = array<i64: 8, 1024>}, {pipeline_mode = #tpu.pipeline_mode<synchronous>, transform_indices = @transform_1, window_bounds = array<i64: 1024, 256>}, {pipeline_mode = #tpu.pipeline_mode<synchronous>, transform_indices = @transform_2, window_bounds = array<i64: 1, 256>}, {pipeline_mode = #tpu.pipeline_mode<synchronous>, transform_indices = @transform_3, window_bounds = array<i64: 256, 128>}, {pipeline_mode = #tpu.pipeline_mode<synchronous>, transform_indices = @transform_4, window_bounds = array<i64: 1, 128>}, {transform_indices = @transform_5, window_bounds = array<i64: 8, 128>}]} {
    %c0 = arith.constant 0 : index
    %c0_0 = arith.constant 0 : index
    %0 = vector.load %arg1[%c0, %c0_0] : memref<8x1024xf32, #tpu.memory_space<vmem>>, vector<8x1024xf32>
    %c0_1 = arith.constant 0 : index
    %c0_2 = arith.constant 0 : index
    %1 = vector.load %arg2[%c0_1, %c0_2] : memref<1024x256xf32, #tpu.memory_space<vmem>>, vector<1024x256xf32>
    %cst = arith.constant dense<0.000000e+00> : vector<8x256xf32>
    %2 = tpu.matmul %0, %1, %cst {dimension_numbers = #tpu.dot_dimension_numbers<[1], [0], [0], [1], [0, 0, 1, 1], [], []>} : vector<8x1024xf32>, vector<1024x256xf32>, vector<8x256xf32> -> vector<8x256xf32>
    %c0_3 = arith.constant 0 : index
    %c0_4 = arith.constant 0 : index
    %3 = vector.load %arg3[%c0_3, %c0_4] : memref<1x256xf32, #tpu.memory_space<vmem>>, vector<1x256xf32>
    %4 = vector.broadcast %3 : vector<1x256xf32> to vector<8x256xf32>
    %5 = arith.addf %2, %4 : vector<8x256xf32>
    %cst_5 = arith.constant 0.000000e+00 : f32
    %6 = vector.broadcast %cst_5 : f32 to vector<8x256xf32>
    %7 = arith.maximumf %5, %6 : vector<8x256xf32>
    %c0_6 = arith.constant 0 : index
    %c0_7 = arith.constant 0 : index
    %8 = vector.load %arg4[%c0_6, %c0_7] : memref<256x128xf32, #tpu.memory_space<vmem>>, vector<256x128xf32>
    %cst_8 = arith.constant dense<0.000000e+00> : vector<8x128xf32>
    %9 = tpu.matmul %7, %8, %cst_8 {dimension_numbers = #tpu.dot_dimension_numbers<[1], [0], [0], [1], [0, 0, 1, 1], [], []>} : vector<8x256xf32>, vector<256x128xf32>, vector<8x128xf32> -> vector<8x128xf32>
    %c0_9 = arith.constant 0 : index
    %c0_10 = arith.constant 0 : index
    %10 = vector.load %arg5[%c0_9, %c0_10] : memref<1x128xf32, #tpu.memory_space<vmem>>, vector<1x128xf32>
    %11 = vector.broadcast %10 : vector<1x128xf32> to vector<8x128xf32>
    %12 = arith.addf %9, %11 : vector<8x128xf32>
    %c0_11 = arith.constant 0 : index
    %c0_12 = arith.constant 0 : index
    %13 = vector.load %arg6[%c0_11, %c0_12] : memref<8x128xf32, #tpu.memory_space<vmem>>, vector<8x128xf32>
    tpu.vector_store %arg6[%c0_11, %c0_12], %12 {strides = array<i32>} : memref<8x128xf32, #tpu.memory_space<vmem>>, vector<8x128xf32>,
    return
  }
  func.func @transform_0(%arg0: i32) -> (i32, i32) {
    %c0_i32 = arith.constant 0 : i32
    %c0_i32_0 = arith.constant 0 : i32
    return %arg0, %c0_i32 : i32, i32
  }
  func.func @transform_1(%arg0: i32) -> (i32, i32) {
    %c0_i32 = arith.constant 0 : i32
    %c0_i32_0 = arith.constant 0 : i32
    %c0_i32_1 = arith.constant 0 : i32
    return %c0_i32, %c0_i32_0 : i32, i32
  }
  func.func @transform_2(%arg0: i32) -> (i32, i32) {
    %c0_i32 = arith.constant 0 : i32
    %c0_i32_0 = arith.constant 0 : i32
    %c0_i32_1 = arith.constant 0 : i32
    return %c0_i32, %c0_i32_0 : i32, i32
  }
  func.func @transform_3(%arg0: i32) -> (i32, i32) {
    %c0_i32 = arith.constant 0 : i32
    %c0_i32_0 = arith.constant 0 : i32
    %c0_i32_1 = arith.constant 0 : i32
    return %c0_i32, %c0_i32_0 : i32, i32
  }
  func.func @transform_4(%arg0: i32) -> (i32, i32) {
    %c0_i32 = arith.constant 0 : i32
    %c0_i32_0 = arith.constant 0 : i32
    %c0_i32_1 = arith.constant 0 : i32
    return %c0_i32, %c0_i32_0 : i32, i32
  }
  func.func @transform_5(%arg0: i32) -> (i32, i32) {
    %c0_i32 = arith.constant 0 : i32
    %c0_i32_0 = arith.constant 0 : i32
    return %arg0, %c0_i32 : i32, i32
  }
}

</mosaic_0001>

<bundles_post_ra>
// kernel: tpu_custom_call.1
= control target key start
LH: loop header
LB: loop body
LE: loop exit
PB: predicated region body
PF: predicated region fallthrough
CT: control target
= control target key end

     0   :  { %10 = vsyncpa [#allocation3], 0  ;;  %s995_s0 = inlined_call_operand.hbm [shape: f32[8,1024], index: 0, kind: input, shape index: {}]   ;;  %s996_s1 = inlined_call_operand.hbm [shape: f32[1024,256], index: 1, kind: input, shape index: {}]   ;;  %s997_s2 = inlined_call_operand.hbm [shape: f32[1,256], index: 2, kind: input, shape index: {}]   ;;  %s998_s3 = inlined_call_operand.hbm [shape: f32[256,128], index: 3, kind: input, shape index: {}]   ;;  %s999_s4 = inlined_call_operand.vmem [shape: f32[1,128], index: 4, kind: input, shape index: {}]   ;;  %s1000_s5 = inlined_call_operand.hbm [shape: f32[8,128], index: 5, kind: output, shape index: {}]  }
   0x1   :  { %11 = vsyncpa [#allocation6], 0 }
   0x2   :  { %12 = vsyncpa [#allocation9], 0  ;;  %s29_s20 = sshll.u32 %s996_s1, 4  ;;  %s30_s20 = int_to_ptr.hbm [resolvable:$true] %s29_s20 }
   0x3   :  { %13 = vsyncpa [#allocation4], 0  ;;  %s906_s21 = smov [#allocation5]   ;;  %s19_s25 = sshll.u32 %s995_s0, 4  ;;  %s20_s25 = int_to_ptr.hbm [resolvable:$true] %s19_s25 }
   0x4   :  { %s31_s22 = sshll.u32 %s906_s21, 4  ;;  %s907_s26 = smov 256   ;;  %s32_s22 = int_to_ptr.vmem [resolvable:$true] %s31_s22 }
   0x5   :  { %s908_s27 = smov 16   ;;  %s909_s28 = smov [#allocation2]  }
   0x6   :  { %37 = dma.hbm_to_vmem [thread:$0]  %s30_s20, 32768, %s32_s22, [#allocation6], %s907_s26, %s907_s26, %s908_s27  }
   0x7   :  { %s21_s29 = sshll.u32 %s909_s28, 4  ;;  %s43_s7 = sshll.u32 %s997_s2, 4  ;;  %s22_s29 = int_to_ptr.vmem [resolvable:$true] %s21_s29  ;;  %s44_s7 = int_to_ptr.hbm [resolvable:$true] %s43_s7 }
   0x8   :  { %24 = dma.hbm_to_vmem [thread:$0]  %s20_s25, 1024, %s22_s29, [#allocation3]  }
   0x9   :  { %s53_s9 = sshll.u32 %s998_s3, 4  ;;  %s910_s10 = smov [#allocation7]   ;;  %s54_s9 = int_to_ptr.hbm [resolvable:$true] %s53_s9 }
   0xa   :  { %s45_s11 = sshll.u32 %s910_s10, 4  ;;  %s911_s0 = smov [#allocation8]   ;;  %s46_s11 = int_to_ptr.vmem [resolvable:$true] %s45_s11 }
   0xb   :  { %48 = dma.hbm_to_vmem [thread:$0]  %s44_s7, 32, %s46_s11, [#allocation6]  }
   0xc   :  { %s55_s12 = sshll.u32 %s911_s0, 4  ;;  %s912_s13 = smov 128   ;;  %s56_s12 = int_to_ptr.vmem [resolvable:$true] %s55_s12 }
   0xd   :  { %s913_s14 = smov 8  }
   0xe   :  { %61 = dma.hbm_to_vmem [thread:$0]  %s54_s9, 4096, %s56_s12, [#allocation9], %s912_s13, %s912_s13, %s913_s14  }
   0xf   :  { %898 = dma.done.wait [#allocation3], 1024  }
  0x10   :  { %899 = vsyncadd [#allocation3], 4294966272 }
  0x11   :  { %900 = dma.done.wait [#allocation6], 32800  }
  0x12   :  { %901 = vsyncadd [#allocation6], 4294934496 }
  0x13   :  { %902 = dma.done.wait [#allocation9], 4096  }
  0x14   :  { %903 = vsyncadd [#allocation9], 4294963200  ;;  %v182_v0 = vld [vmem:[#allocation5 + $0x2f0] sm:$0xff]  ;;  %v180_v2 = vld [vmem:[#allocation5 + $0x2e0] sm:$0xff]  ;;  %s914_s15 = smov [#allocation10]   ;;  %s756_s19 = sshll.u32 %s1000_s5, 4  ;;  %s757_s19 = int_to_ptr.hbm [resolvable:$true] %s756_s19 }
  0x15   :  { %v118_v1 = vld [vmem:[#allocation5 + $0xf0] sm:$0xff]  ;;  %390 = vmatpush.msra.mxu2 %v182_v0  ;;  %v116_v4 = vld [vmem:[#allocation5 + $0xe0] sm:$0xff]  ;;  %s754_s16 = sshll.u32 %s914_s15, 4  ;;  %s755_s16 = int_to_ptr.vmem [resolvable:$true] %s754_s16 }
  0x16   :  { %350 = vmatpush.msra.mxu0 %v118_v1  ;;  %v214_v3 = vld [vmem:[#allocation5 + $0x3f0] sm:$0xff]  ;;  %v212_v7 = vld [vmem:[#allocation5 + $0x3e0] sm:$0xff] }
  0x17   :  { %v150_v5 = vld [vmem:[#allocation5 + $0x1f0] sm:$0xff]  ;;  %410 = vmatpush.msra.mxu3 %v214_v3  ;;  %391 = vmatpush.msra.mxu2 %v180_v2  ;;  %v148_v9 = vld [vmem:[#allocation5 + $0x1e0] sm:$0xff] }
  0x18   :  { %370 = vmatpush.msra.mxu1 %v150_v5  ;;  %v178_v6 = vld [vmem:[#allocation5 + $0x2d0] sm:$0xff]  ;;  %351 = vmatpush.msra.mxu0 %v116_v4  ;;  %v176_v11 = vld [vmem:[#allocation5 + $0x2c0] sm:$0xff] }
  0x19   :  { %v114_v8 = vld [vmem:[#allocation5 + $0xd0] sm:$0xff]  ;;  %411 = vmatpush.msra.mxu3 %v212_v7  ;;  %v112_v12 = vld [vmem:[#allocation5 + $0xc0] sm:$0xff]  ;;  %392 = vmatpush.msra.mxu2 %v178_v6 }
  0x1a   :  { %v210_v10 = vld [vmem:[#allocation5 + $0x3d0] sm:$0xff]  ;;  %371 = vmatpush.msra.mxu1 %v148_v9  ;;  %352 = vmatpush.msra.mxu0 %v114_v8  ;;  %v208_v14 = vld [vmem:[#allocation5 + $0x3c0] sm:$0xff] }
  0x1b   :  { %v146_v13 = vld [vmem:[#allocation5 + $0x1d0] sm:$0xff]  ;;  %v144_v15 = vld [vmem:[#allocation5 + $0x1c0] sm:$0xff]  ;;  %412 = vmatpush.msra.mxu3 %v210_v10  ;;  %393 = vmatpush.msra.mxu2 %v176_v11 }
  0x1c   :  { %372 = vmatpush.msra.mxu1 %v146_v13  ;;  %v174_v16 = vld [vmem:[#allocation5 + $0x2b0] sm:$0xff]  ;;  %353 = vmatpush.msra.mxu0 %v112_v12  ;;  %v172_v20 = vld [vmem:[#allocation5 + $0x2a0] sm:$0xff] }
  0x1d   :  { %v110_v17 = vld [vmem:[#allocation5 + $0xb0] sm:$0xff]  ;;  %413 = vmatpush.msra.mxu3 %v208_v14  ;;  %v108_v21 = vld [vmem:[#allocation5 + $0xa0] sm:$0xff]  ;;  %394 = vmatpush.msra.mxu2 %v174_v16 }
  0x1e   :  { %v206_v18 = vld [vmem:[#allocation5 + $0x3b0] sm:$0xff]  ;;  %373 = vmatpush.msra.mxu1 %v144_v15  ;;  %354 = vmatpush.msra.mxu0 %v110_v17  ;;  %v204_v22 = vld [vmem:[#allocation5 + $0x3a0] sm:$0xff] }
  0x1f   :  { %v142_v19 = vld [vmem:[#allocation5 + $0x1b0] sm:$0xff]  ;;  %v140_v23 = vld [vmem:[#allocation5 + $0x1a0] sm:$0xff]  ;;  %414 = vmatpush.msra.mxu3 %v206_v18  ;;  %395 = vmatpush.msra.mxu2 %v172_v20 }
  0x20   :  { %374 = vmatpush.msra.mxu1 %v142_v19  ;;  %v170_v24 = vld [vmem:[#allocation5 + $0x290] sm:$0xff]  ;;  %355 = vmatpush.msra.mxu0 %v108_v21  ;;  %v168_v28 = vld [vmem:[#allocation5 + $0x280] sm:$0xff] }
  0x21   :  { %v106_v25 = vld [vmem:[#allocation5 + $0x90] sm:$0xff]  ;;  %415 = vmatpush.msra.mxu3 %v204_v22  ;;  %v104_v29 = vld [vmem:[#allocation5 + $0x80] sm:$0xff]  ;;  %396 = vmatpush.msra.mxu2 %v170_v24 }
  0x22   :  { %v202_v26 = vld [vmem:[#allocation5 + $0x390] sm:$0xff]  ;;  %375 = vmatpush.msra.mxu1 %v140_v23  ;;  %356 = vmatpush.msra.mxu0 %v106_v25  ;;  %v200_v30 = vld [vmem:[#allocation5 + $0x380] sm:$0xff] }
  0x23   :  { %v138_v27 = vld [vmem:[#allocation5 + $0x190] sm:$0xff]  ;;  %v136_v31 = vld [vmem:[#allocation5 + $0x180] sm:$0xff]  ;;  %416 = vmatpush.msra.mxu3 %v202_v26  ;;  %397 = vmatpush.msra.mxu2 %v168_v28 }
  0x24   :  { %376 = vmatpush.msra.mxu1 %v138_v27  ;;  %v166_v32 = vld [vmem:[#allocation5 + $0x270] sm:$0xff]  ;;  %357 = vmatpush.msra.mxu0 %v104_v29  ;;  %v164_v36 = vld [vmem:[#allocation5 + $0x260] sm:$0xff] }
  0x25   :  { %v102_v33 = vld [vmem:[#allocation5 + $0x70] sm:$0xff]  ;;  %417 = vmatpush.msra.mxu3 %v200_v30  ;;  %v100_v37 = vld [vmem:[#allocation5 + $0x60] sm:$0xff]  ;;  %398 = vmatpush.msra.mxu2 %v166_v32 }
  0x26   :  { %v198_v34 = vld [vmem:[#allocation5 + $0x370] sm:$0xff]  ;;  %377 = vmatpush.msra.mxu1 %v136_v31  ;;  %358 = vmatpush.msra.mxu0 %v102_v33  ;;  %v196_v38 = vld [vmem:[#allocation5 + $0x360] sm:$0xff] }
  0x27   :  { %v134_v35 = vld [vmem:[#allocation5 + $0x170] sm:$0xff]  ;;  %v132_v39 = vld [vmem:[#allocation5 + $0x160] sm:$0xff]  ;;  %418 = vmatpush.msra.mxu3 %v198_v34  ;;  %399 = vmatpush.msra.mxu2 %v164_v36 }
  0x28   :  { %378 = vmatpush.msra.mxu1 %v134_v35  ;;  %v162_v40 = vld [vmem:[#allocation5 + $0x250] sm:$0xff]  ;;  %359 = vmatpush.msra.mxu0 %v100_v37  ;;  %v160_v44 = vld [vmem:[#allocation5 + $0x240] sm:$0xff] }
  0x29   :  { %v98_v41 = vld [vmem:[#allocation5 + $0x50] sm:$0xff]  ;;  %419 = vmatpush.msra.mxu3 %v196_v38  ;;  %v96_v45 = vld [vmem:[#allocation5 + $0x40] sm:$0xff]  ;;  %400 = vmatpush.msra.mxu2 %v162_v40 }
  0x2a   :  { %v194_v42 = vld [vmem:[#allocation5 + $0x350] sm:$0xff]  ;;  %379 = vmatpush.msra.mxu1 %v132_v39  ;;  %360 = vmatpush.msra.mxu0 %v98_v41  ;;  %v192_v46 = vld [vmem:[#allocation5 + $0x340] sm:$0xff] }
  0x2b   :  { %v130_v43 = vld [vmem:[#allocation5 + $0x150] sm:$0xff]  ;;  %v128_v47 = vld [vmem:[#allocation5 + $0x140] sm:$0xff]  ;;  %420 = vmatpush.msra.mxu3 %v194_v42  ;;  %401 = vmatpush.msra.mxu2 %v160_v44 }
  0x2c   :  { %380 = vmatpush.msra.mxu1 %v130_v43  ;;  %v158_v48 = vld [vmem:[#allocation5 + $0x230] sm:$0xff]  ;;  %361 = vmatpush.msra.mxu0 %v96_v45  ;;  %v156_v52 = vld [vmem:[#allocation5 + $0x220] sm:$0xff] }
  0x2d   :  { %v94_v49 = vld [vmem:[#allocation5 + $0x30] sm:$0xff]  ;;  %421 = vmatpush.msra.mxu3 %v192_v46  ;;  %v92_v53 = vld [vmem:[#allocation5 + $0x20] sm:$0xff]  ;;  %402 = vmatpush.msra.mxu2 %v158_v48 }
  0x2e   :  { %v190_v50 = vld [vmem:[#allocation5 + $0x330] sm:$0xff]  ;;  %381 = vmatpush.msra.mxu1 %v128_v47  ;;  %362 = vmatpush.msra.mxu0 %v94_v49  ;;  %v188_v54 = vld [vmem:[#allocation5 + $0x320] sm:$0xff] }
  0x2f   :  { %v126_v51 = vld [vmem:[#allocation5 + $0x130] sm:$0xff]  ;;  %v124_v55 = vld [vmem:[#allocation5 + $0x120] sm:$0xff]  ;;  %422 = vmatpush.msra.mxu3 %v190_v50  ;;  %403 = vmatpush.msra.mxu2 %v156_v52 }
  0x30   :  { %382 = vmatpush.msra.mxu1 %v126_v51  ;;  %v154_v56 = vld [vmem:[#allocation5 + $0x210] sm:$0xff]  ;;  %363 = vmatpush.msra.mxu0 %v92_v53  ;;  %v152_v60 = vld [vmem:[#allocation5 + $0x200] sm:$0xff] }
  0x31   :  { %v90_v57 = vld [vmem:[#allocation5 + $0x10] sm:$0xff]  ;;  %423 = vmatpush.msra.mxu3 %v188_v54  ;;  %v88_v61 = vld [vmem:[#allocation5] sm:$0xff]  ;;  %404 = vmatpush.msra.mxu2 %v154_v56 }
  0x32   :  { %v186_v58 = vld [vmem:[#allocation5 + $0x310] sm:$0xff]  ;;  %383 = vmatpush.msra.mxu1 %v124_v55  ;;  %364 = vmatpush.msra.mxu0 %v90_v57  ;;  %v184_v63 = vld [vmem:[#allocation5 + $0x300] sm:$0xff] }
  0x33   :  { %v122_v59 = vld [vmem:[#allocation5 + $0x110] sm:$0xff]  ;;  %424 = vmatpush.msra.mxu3 %v186_v58  ;;  %405 = vmatpush.msra.mxu2 %v152_v60  ;;  %v308_v2 = vld [vmem:[#allocation5 + $0x6e0] sm:$0xff] }
  0x34   :  { %v310_v62 = vld [vmem:[#allocation5 + $0x6f0] sm:$0xff]  ;;  %384 = vmatpush.msra.mxu1 %v122_v59  ;;  %365 = vmatpush.msra.mxu0 %v88_v61  ;;  %v120_v3 = vld [vmem:[#allocation5 + $0x100] sm:$0xff] }
  0x35   :  { %v246_v0 = vld [vmem:[#allocation5 + $0x4f0] sm:$0xff]  ;;  %470 = vmatpush.msrb.mxu2 %v310_v62  ;;  %425 = vmatpush.msra.mxu3 %v184_v63  ;;  %v244_v4 = vld [vmem:[#allocation5 + $0x4e0] sm:$0xff]  ;;  %v183_v62 = vld [vmem:[#allocation5 + $0x2f8] sm:$0xff] }
  0x36   :  { %v342_v1 = vld [vmem:[#allocation5 + $0x7f0] sm:$0xff]  ;;  %430 = vmatpush.msrb.mxu0 %v246_v0  ;;  %v340_v7 = vld [vmem:[#allocation5 + $0x7e0] sm:$0xff]  ;;  %385 = vmatpush.msra.mxu1 %v120_v3  ;;  %v119_v3 = vld [vmem:[#allocation5 + $0xf8] sm:$0xff] }
  0x37   :  { %v278_v5 = vld [vmem:[#allocation5 + $0x5f0] sm:$0xff]  ;;  %490 = vmatpush.msrb.mxu3 %v342_v1  ;;  %471 = vmatpush.msrb.mxu2 %v308_v2  ;;  %v276_v9 = vld [vmem:[#allocation5 + $0x5e0] sm:$0xff]  ;;  %v962_v2 = vld [vmem:[#allocation2 + $0x18] sm:$0xff] }
  0x38   :  { %v306_v6 = vld [vmem:[#allocation5 + $0x6d0] sm:$0xff]  ;;  %431 = vmatpush.msrb.mxu0 %v244_v4  ;;  %450 = vmatpush.msrb.mxu1 %v278_v5  ;;  %v304_v10 = vld [vmem:[#allocation5 + $0x6c0] sm:$0xff]  ;;  %v181_v4 = vld [vmem:[#allocation5 + $0x2e8] sm:$0xff] }
  0x39   :  { %v242_v8 = vld [vmem:[#allocation5 + $0x4d0] sm:$0xff]  ;;  %472 = vmatpush.msrb.mxu2 %v306_v6  ;;  %491 = vmatpush.msrb.mxu3 %v340_v7  ;;  %v240_v12 = vld [vmem:[#allocation5 + $0x4c0] sm:$0xff]  ;;  %v215_v5 = vld [vmem:[#allocation5 + $0x3f8] sm:$0xff] }
  0x3a   :  { %v338_v11 = vld [vmem:[#allocation5 + $0x7d0] sm:$0xff]  ;;  %432 = vmatpush.msrb.mxu0 %v242_v8  ;;  %451 = vmatpush.msrb.mxu1 %v276_v9  ;;  %v336_v15 = vld [vmem:[#allocation5 + $0x7c0] sm:$0xff]  ;;  %v117_v7 = vld [vmem:[#allocation5 + $0xe8] sm:$0xff] }
  0x3b   :  { %v274_v13 = vld [vmem:[#allocation5 + $0x5d0] sm:$0xff]  ;;  %473 = vmatpush.msrb.mxu2 %v304_v10  ;;  %492 = vmatpush.msrb.mxu3 %v338_v11  ;;  %v272_v17 = vld [vmem:[#allocation5 + $0x5c0] sm:$0xff]  ;;  %v966_v8 = vld [vmem:[#allocation2 + $0x8] sm:$0xff] }
  0x3c   :  { %v302_v14 = vld [vmem:[#allocation5 + $0x6b0] sm:$0xff]  ;;  %433 = vmatpush.msrb.mxu0 %v240_v12  ;;  %452 = vmatpush.msrb.mxu1 %v274_v13  ;;  %v300_v18 = vld [vmem:[#allocation5 + $0x6a0] sm:$0xff]  ;;  %v179_v9 = vld [vmem:[#allocation5 + $0x2d8] sm:$0xff] }
  0x3d   :  { %v238_v16 = vld [vmem:[#allocation5 + $0x4b0] sm:$0xff]  ;;  %474 = vmatpush.msrb.mxu2 %v302_v14  ;;  %493 = vmatpush.msrb.mxu3 %v336_v15  ;;  %v236_v20 = vld [vmem:[#allocation5 + $0x4a0] sm:$0xff]  ;;  %v151_v10 = vld [vmem:[#allocation5 + $0x1f8] sm:$0xff] }
  0x3e   :  { %v334_v19 = vld [vmem:[#allocation5 + $0x7b0] sm:$0xff]  ;;  %434 = vmatpush.msrb.mxu0 %v238_v16  ;;  %453 = vmatpush.msrb.mxu1 %v272_v17  ;;  %v332_v23 = vld [vmem:[#allocation5 + $0x7a0] sm:$0xff]  ;;  %v213_v11 = vld [vmem:[#allocation5 + $0x3e8] sm:$0xff] }
  0x3f   :  { %v270_v21 = vld [vmem:[#allocation5 + $0x5b0] sm:$0xff]  ;;  %475 = vmatpush.msrb.mxu2 %v300_v18  ;;  %494 = vmatpush.msrb.mxu3 %v334_v19  ;;  %v268_v25 = vld [vmem:[#allocation5 + $0x5a0] sm:$0xff]  ;;  %v115_v12 = vld [vmem:[#allocation5 + $0xd8] sm:$0xff] }
  0x40   :  { %v298_v22 = vld [vmem:[#allocation5 + $0x690] sm:$0xff]  ;;  %435 = vmatpush.msrb.mxu0 %v236_v20  ;;  %454 = vmatpush.msrb.mxu1 %v270_v21  ;;  %v296_v26 = vld [vmem:[#allocation5 + $0x680] sm:$0xff]  ;;  %v177_v13 = vld [vmem:[#allocation5 + $0x2c8] sm:$0xff] }
  0x41   :  { %v234_v24 = vld [vmem:[#allocation5 + $0x490] sm:$0xff]  ;;  %476 = vmatpush.msrb.mxu2 %v298_v22  ;;  %495 = vmatpush.msrb.mxu3 %v332_v23  ;;  %v232_v28 = vld [vmem:[#allocation5 + $0x480] sm:$0xff]  ;;  %v149_v14 = vld [vmem:[#allocation5 + $0x1e8] sm:$0xff] }
  0x42   :  { %v330_v27 = vld [vmem:[#allocation5 + $0x790] sm:$0xff]  ;;  %436 = vmatpush.msrb.mxu0 %v234_v24  ;;  %455 = vmatpush.msrb.mxu1 %v268_v25  ;;  %v328_v31 = vld [vmem:[#allocation5 + $0x780] sm:$0xff]  ;;  %v211_v15 = vld [vmem:[#allocation5 + $0x3d8] sm:$0xff] }
  0x43   :  { %v266_v29 = vld [vmem:[#allocation5 + $0x590] sm:$0xff]  ;;  %477 = vmatpush.msrb.mxu2 %v296_v26  ;;  %496 = vmatpush.msrb.mxu3 %v330_v27  ;;  %v264_v33 = vld [vmem:[#allocation5 + $0x580] sm:$0xff]  ;;  %v113_v17 = vld [vmem:[#allocation5 + $0xc8] sm:$0xff] }
  0x44   :  { %v294_v30 = vld [vmem:[#allocation5 + $0x670] sm:$0xff]  ;;  %437 = vmatpush.msrb.mxu0 %v232_v28  ;;  %456 = vmatpush.msrb.mxu1 %v266_v29  ;;  %v292_v34 = vld [vmem:[#allocation5 + $0x660] sm:$0xff]  ;;  %v147_v18 = vld [vmem:[#allocation5 + $0x1d8] sm:$0xff] }
  0x45   :  { %v230_v32 = vld [vmem:[#allocation5 + $0x470] sm:$0xff]  ;;  %478 = vmatpush.msrb.mxu2 %v294_v30  ;;  %497 = vmatpush.msrb.mxu3 %v328_v31  ;;  %v228_v36 = vld [vmem:[#allocation5 + $0x460] sm:$0xff]  ;;  %v175_v19 = vld [vmem:[#allocation5 + $0x2b8] sm:$0xff] }
  0x46   :  { %v326_v35 = vld [vmem:[#allocation5 + $0x770] sm:$0xff]  ;;  %438 = vmatpush.msrb.mxu0 %v230_v32  ;;  %457 = vmatpush.msrb.mxu1 %v264_v33  ;;  %v324_v39 = vld [vmem:[#allocation5 + $0x760] sm:$0xff]  ;;  %v209_v20 = vld [vmem:[#allocation5 + $0x3c8] sm:$0xff] }
  0x47   :  { %v262_v37 = vld [vmem:[#allocation5 + $0x570] sm:$0xff]  ;;  %479 = vmatpush.msrb.mxu2 %v292_v34  ;;  %498 = vmatpush.msrb.mxu3 %v326_v35  ;;  %v260_v41 = vld [vmem:[#allocation5 + $0x560] sm:$0xff]  ;;  %v974_v22 = vld [vmem:[#allocation2 + $0x38] sm:$0xff] }
  0x48   :  { %v290_v38 = vld [vmem:[#allocation5 + $0x650] sm:$0xff]  ;;  %439 = vmatpush.msrb.mxu0 %v228_v36  ;;  %458 = vmatpush.msrb.mxu1 %v262_v37  ;;  %v288_v42 = vld [vmem:[#allocation5 + $0x640] sm:$0xff]  ;;  %v111_v23 = vld [vmem:[#allocation5 + $0xb8] sm:$0xff] }
  0x49   :  { %v226_v40 = vld [vmem:[#allocation5 + $0x450] sm:$0xff]  ;;  %480 = vmatpush.msrb.mxu2 %v290_v38  ;;  %499 = vmatpush.msrb.mxu3 %v324_v39  ;;  %v224_v44 = vld [vmem:[#allocation5 + $0x440] sm:$0xff]  ;;  %v145_v24 = vld [vmem:[#allocation5 + $0x1c8] sm:$0xff] }
  0x4a   :  { %v322_v43 = vld [vmem:[#allocation5 + $0x750] sm:$0xff]  ;;  %440 = vmatpush.msrb.mxu0 %v226_v40  ;;  %459 = vmatpush.msrb.mxu1 %v260_v41  ;;  %v320_v47 = vld [vmem:[#allocation5 + $0x740] sm:$0xff]  ;;  %v173_v25 = vld [vmem:[#allocation5 + $0x2a8] sm:$0xff] }
  0x4b   :  { %v258_v45 = vld [vmem:[#allocation5 + $0x550] sm:$0xff]  ;;  %481 = vmatpush.msrb.mxu2 %v288_v42  ;;  %500 = vmatpush.msrb.mxu3 %v322_v43  ;;  %v256_v49 = vld [vmem:[#allocation5 + $0x540] sm:$0xff]  ;;  %v207_v26 = vld [vmem:[#allocation5 + $0x3b8] sm:$0xff] }
  0x4c   :  { %v286_v46 = vld [vmem:[#allocation5 + $0x630] sm:$0xff]  ;;  %441 = vmatpush.msrb.mxu0 %v224_v44  ;;  %460 = vmatpush.msrb.mxu1 %v258_v45  ;;  %v284_v50 = vld [vmem:[#allocation5 + $0x620] sm:$0xff]  ;;  %v977_v27 = vld [vmem:[#allocation2 + $0x28] sm:$0xff] }
  0x4d   :  { %v222_v48 = vld [vmem:[#allocation5 + $0x430] sm:$0xff]  ;;  %482 = vmatpush.msrb.mxu2 %v286_v46  ;;  %501 = vmatpush.msrb.mxu3 %v320_v47  ;;  %v220_v52 = vld [vmem:[#allocation5 + $0x420] sm:$0xff]  ;;  %v109_v28 = vld [vmem:[#allocation5 + $0xa8] sm:$0xff] }
  0x4e   :  { %v318_v51 = vld [vmem:[#allocation5 + $0x730] sm:$0xff]  ;;  %442 = vmatpush.msrb.mxu0 %v222_v48  ;;  %461 = vmatpush.msrb.mxu1 %v256_v49  ;;  %v316_v55 = vld [vmem:[#allocation5 + $0x720] sm:$0xff]  ;;  %v143_v29 = vld [vmem:[#allocation5 + $0x1b8] sm:$0xff] }
  0x4f   :  { %v254_v53 = vld [vmem:[#allocation5 + $0x530] sm:$0xff]  ;;  %483 = vmatpush.msrb.mxu2 %v284_v50  ;;  %502 = vmatpush.msrb.mxu3 %v318_v51  ;;  %v252_v57 = vld [vmem:[#allocation5 + $0x520] sm:$0xff]  ;;  %v171_v30 = vld [vmem:[#allocation5 + $0x298] sm:$0xff] }
  0x50   :  { %v282_v54 = vld [vmem:[#allocation5 + $0x610] sm:$0xff]  ;;  %443 = vmatpush.msrb.mxu0 %v220_v52  ;;  %462 = vmatpush.msrb.mxu1 %v254_v53  ;;  %v280_v58 = vld [vmem:[#allocation5 + $0x600] sm:$0xff]  ;;  %v205_v31 = vld [vmem:[#allocation5 + $0x3a8] sm:$0xff] }
  0x51   :  { %v218_v56 = vld [vmem:[#allocation5 + $0x410] sm:$0xff]  ;;  %484 = vmatpush.msrb.mxu2 %v282_v54  ;;  %503 = vmatpush.msrb.mxu3 %v316_v55  ;;  %v216_v61 = vld [vmem:[#allocation5 + $0x400] sm:$0xff]  ;;  %v107_v32 = vld [vmem:[#allocation5 + $0x98] sm:$0xff] }
  0x52   :  { %v314_v59 = vld [vmem:[#allocation5 + $0x710] sm:$0xff]  ;;  %444 = vmatpush.msrb.mxu0 %v218_v56  ;;  %463 = vmatpush.msrb.mxu1 %v252_v57  ;;  %v312_v0 = vld [vmem:[#allocation5 + $0x700] sm:$0xff]  ;;  %v141_v33 = vld [vmem:[#allocation5 + $0x1a8] sm:$0xff] }
  0x53   :  { %v957_v60 = vld [vmem:[#allocation2 + $0x10] sm:$0xff]  ;;  %485 = vmatpush.msrb.mxu2 %v280_v58  ;;  %504 = vmatpush.msrb.mxu3 %v314_v59  ;;  %v959_v1 = vld [vmem:[#allocation2] sm:$0xff]  ;;  %v169_v34 = vld [vmem:[#allocation5 + $0x288] sm:$0xff] }
  0x54   :  { %v250_v63 = vld [vmem:[#allocation5 + $0x510] sm:$0xff]  ;;  %406 = vmatmul.f32.vlgmr.msra.gmra.mxu2 %v957_v60  ;;  %445 = vmatpush.msrb.mxu0 %v216_v61  ;;  %v248_v6 = vld [vmem:[#allocation5 + $0x500] sm:$0xff]  ;;  %v203_v35 = vld [vmem:[#allocation5 + $0x398] sm:$0xff] }
  0x55   :  { %550 = vmatpush.msra.mxu2 %v183_v62  ;;  %464 = vmatpush.msrb.mxu1 %v250_v63  ;;  %v969_v16 = vld [vmem:[#allocation2 + $0x30] sm:$0xff]  ;;  %v971_v21 = vld [vmem:[#allocation2 + $0x20] sm:$0xff]  ;;  %v105_v36 = vld [vmem:[#allocation5 + $0x88] sm:$0xff] }
  0x56   :  { %505 = vmatpush.msrb.mxu3 %v312_v0  ;;  %366 = vmatmul.f32.vlgmr.msra.gmra.mxu0 %v959_v1  ;;  %v139_v37 = vld [vmem:[#allocation5 + $0x198] sm:$0xff]  ;;  %v201_v39 = vld [vmem:[#allocation5 + $0x388] sm:$0xff] }
  0x57   :  { %426 = vmatmul.f32.vlgmr.msra.gmra.mxu3 %v962_v2  ;;  %510 = vmatpush.msra.mxu0 %v119_v3  ;;  %v167_v38 = vld [vmem:[#allocation5 + $0x278] sm:$0xff]  ;;  %v137_v41 = vld [vmem:[#allocation5 + $0x188] sm:$0xff] }
  0x58   :  { %551 = vmatpush.msra.mxu2 %v181_v4  ;;  %570 = vmatpush.msra.mxu3 %v215_v5  ;;  %v103_v40 = vld [vmem:[#allocation5 + $0x78] sm:$0xff]  ;;  %v165_v42 = vld [vmem:[#allocation5 + $0x268] sm:$0xff] }
  0x59   :  { %465 = vmatpush.msrb.mxu1 %v248_v6  ;;  %511 = vmatpush.msra.mxu0 %v117_v7  ;;  %v199_v43 = vld [vmem:[#allocation5 + $0x378] sm:$0xff]  ;;  %v101_v44 = vld [vmem:[#allocation5 + $0x68] sm:$0xff] }
  0x5a   :  { %386 = vmatmul.f32.vlgmr.msra.gmra.mxu1 %v966_v8  ;;  %552 = vmatpush.msra.mxu2 %v179_v9  ;;  %v135_v45 = vld [vmem:[#allocation5 + $0x178] sm:$0xff]  ;;  %v197_v47 = vld [vmem:[#allocation5 + $0x368] sm:$0xff] }
  0x5b   :  { %530 = vmatpush.msra.mxu1 %v151_v10  ;;  %571 = vmatpush.msra.mxu3 %v213_v11  ;;  %v163_v46 = vld [vmem:[#allocation5 + $0x258] sm:$0xff]  ;;  %v133_v49 = vld [vmem:[#allocation5 + $0x168] sm:$0xff] }
  0x5c   :  { %512 = vmatpush.msra.mxu0 %v115_v12  ;;  %553 = vmatpush.msra.mxu2 %v177_v13  ;;  %v99_v48 = vld [vmem:[#allocation5 + $0x58] sm:$0xff]  ;;  %v161_v50 = vld [vmem:[#allocation5 + $0x248] sm:$0xff] }
  0x5d   :  { %531 = vmatpush.msra.mxu1 %v149_v14  ;;  %572 = vmatpush.msra.mxu3 %v211_v15  ;;  %v195_v51 = vld [vmem:[#allocation5 + $0x358] sm:$0xff]  ;;  %v97_v52 = vld [vmem:[#allocation5 + $0x48] sm:$0xff] }
  0x5e   :  { %486 = vmatmul.f32.vlgmr.msrb.gmra.mxu2 %v969_v16  ;;  %513 = vmatpush.msra.mxu0 %v113_v17  ;;  %v131_v53 = vld [vmem:[#allocation5 + $0x158] sm:$0xff]  ;;  %v193_v55 = vld [vmem:[#allocation5 + $0x348] sm:$0xff] }
  0x5f   :  { %532 = vmatpush.msra.mxu1 %v147_v18  ;;  %554 = vmatpush.msra.mxu2 %v175_v19  ;;  %v159_v54 = vld [vmem:[#allocation5 + $0x238] sm:$0xff]  ;;  %v129_v57 = vld [vmem:[#allocation5 + $0x148] sm:$0xff] }
  0x60   :  { %573 = vmatpush.msra.mxu3 %v209_v20  ;;  %446 = vmatmul.f32.vlgmr.msrb.gmra.mxu0 %v971_v21  ;;  %v95_v56 = vld [vmem:[#allocation5 + $0x38] sm:$0xff]  ;;  %v157_v58 = vld [vmem:[#allocation5 + $0x228] sm:$0xff] }
  0x61   :  { %506 = vmatmul.f32.vlgmr.msrb.gmra.mxu3 %v974_v22  ;;  %514 = vmatpush.msra.mxu0 %v111_v23  ;;  %v191_v59 = vld [vmem:[#allocation5 + $0x338] sm:$0xff]  ;;  %v93_v61 = vld [vmem:[#allocation5 + $0x28] sm:$0xff] }
  0x62   :  { %533 = vmatpush.msra.mxu1 %v145_v24  ;;  %555 = vmatpush.msra.mxu2 %v173_v25  ;;  %v127_v62 = vld [vmem:[#allocation5 + $0x138] sm:$0xff]  ;;  %v189_v0 = vld [vmem:[#allocation5 + $0x328] sm:$0xff] }
  0x63   :  { %574 = vmatpush.msra.mxu3 %v207_v26  ;;  %466 = vmatmul.f32.vlgmr.msrb.gmra.mxu1 %v977_v27  ;;  %v155_v63 = vld [vmem:[#allocation5 + $0x218] sm:$0xff]  ;;  %v125_v4 = vld [vmem:[#allocation5 + $0x128] sm:$0xff] }
  0x64   :  { %515 = vmatpush.msra.mxu0 %v109_v28  ;;  %534 = vmatpush.msra.mxu1 %v143_v29  ;;  %v91_v3 = vld [vmem:[#allocation5 + $0x18] sm:$0xff]  ;;  %v153_v5 = vld [vmem:[#allocation5 + $0x208] sm:$0xff] }
  0x65   :  { %556 = vmatpush.msra.mxu2 %v171_v30  ;;  %575 = vmatpush.msra.mxu3 %v205_v31  ;;  %v187_v6 = vld [vmem:[#allocation5 + $0x318] sm:$0xff]  ;;  %v89_v9 = vld [vmem:[#allocation5 + $0x8] sm:$0xff] }
  0x66   :  { %516 = vmatpush.msra.mxu0 %v107_v32  ;;  %535 = vmatpush.msra.mxu1 %v141_v33  ;;  %v311_v7 = vld [vmem:[#allocation5 + $0x6f8] sm:$0xff]  ;;  %v185_v11 = vld [vmem:[#allocation5 + $0x308] sm:$0xff] }
  0x67   :  { %557 = vmatpush.msra.mxu2 %v169_v34  ;;  %576 = vmatpush.msra.mxu3 %v203_v35  ;;  %v123_v10 = vld [vmem:[#allocation5 + $0x118] sm:$0xff]  ;;  %v309_v13 = vld [vmem:[#allocation5 + $0x6e8] sm:$0xff] }
  0x68   :  { %517 = vmatpush.msra.mxu0 %v105_v36  ;;  %536 = vmatpush.msra.mxu1 %v139_v37  ;;  %v247_v12 = vld [vmem:[#allocation5 + $0x4f8] sm:$0xff]  ;;  %v121_v15 = vld [vmem:[#allocation5 + $0x108] sm:$0xff] }
  0x69   :  { %558 = vmatpush.msra.mxu2 %v167_v38  ;;  %577 = vmatpush.msra.mxu3 %v201_v39  ;;  %v343_v14 = vld [vmem:[#allocation5 + $0x7f8] sm:$0xff]  ;;  %v245_v17 = vld [vmem:[#allocation5 + $0x4e8] sm:$0xff] }
  0x6a   :  { %518 = vmatpush.msra.mxu0 %v103_v40  ;;  %537 = vmatpush.msra.mxu1 %v137_v41  ;;  %v279_v18 = vld [vmem:[#allocation5 + $0x5f8] sm:$0xff]  ;;  %v341_v20 = vld [vmem:[#allocation5 + $0x7e8] sm:$0xff] }
  0x6b   :  { %559 = vmatpush.msra.mxu2 %v165_v42  ;;  %578 = vmatpush.msra.mxu3 %v199_v43  ;;  %v307_v19 = vld [vmem:[#allocation5 + $0x6d8] sm:$0xff]  ;;  %v277_v24 = vld [vmem:[#allocation5 + $0x5e8] sm:$0xff] }
  0x6c   :  { %519 = vmatpush.msra.mxu0 %v101_v44  ;;  %538 = vmatpush.msra.mxu1 %v135_v45  ;;  %v243_v23 = vld [vmem:[#allocation5 + $0x4d8] sm:$0xff]  ;;  %v305_v25 = vld [vmem:[#allocation5 + $0x6c8] sm:$0xff] }
  0x6d   :  { %560 = vmatpush.msra.mxu2 %v163_v46  ;;  %579 = vmatpush.msra.mxu3 %v197_v47  ;;  %v339_v26 = vld [vmem:[#allocation5 + $0x7d8] sm:$0xff]  ;;  %v241_v28 = vld [vmem:[#allocation5 + $0x4c8] sm:$0xff] }
  0x6e   :  { %520 = vmatpush.msra.mxu0 %v99_v48  ;;  %539 = vmatpush.msra.mxu1 %v133_v49  ;;  %v275_v29 = vld [vmem:[#allocation5 + $0x5d8] sm:$0xff]  ;;  %v337_v31 = vld [vmem:[#allocation5 + $0x7c8] sm:$0xff] }
  0x6f   :  { %561 = vmatpush.msra.mxu2 %v161_v50  ;;  %580 = vmatpush.msra.mxu3 %v195_v51  ;;  %v303_v30 = vld [vmem:[#allocation5 + $0x6b8] sm:$0xff]  ;;  %v273_v33 = vld [vmem:[#allocation5 + $0x5c8] sm:$0xff] }
  0x70   :  { %521 = vmatpush.msra.mxu0 %v97_v52  ;;  %540 = vmatpush.msra.mxu1 %v131_v53  ;;  %v239_v32 = vld [vmem:[#allocation5 + $0x4b8] sm:$0xff]  ;;  %v301_v34 = vld [vmem:[#allocation5 + $0x6a8] sm:$0xff] }
  0x71   :  { %562 = vmatpush.msra.mxu2 %v159_v54  ;;  %581 = vmatpush.msra.mxu3 %v193_v55  ;;  %v335_v35 = vld [vmem:[#allocation5 + $0x7b8] sm:$0xff]  ;;  %v237_v36 = vld [vmem:[#allocation5 + $0x4a8] sm:$0xff] }
  0x72   :  { %522 = vmatpush.msra.mxu0 %v95_v56  ;;  %541 = vmatpush.msra.mxu1 %v129_v57  ;;  %v271_v37 = vld [vmem:[#allocation5 + $0x5b8] sm:$0xff]  ;;  %v333_v39 = vld [vmem:[#allocation5 + $0x7a8] sm:$0xff] }
  0x73   :  { %563 = vmatpush.msra.mxu2 %v157_v58  ;;  %582 = vmatpush.msra.mxu3 %v191_v59  ;;  %v299_v38 = vld [vmem:[#allocation5 + $0x698] sm:$0xff]  ;;  %v269_v41 = vld [vmem:[#allocation5 + $0x5a8] sm:$0xff] }
  0x74   :  { %523 = vmatpush.msra.mxu0 %v93_v61  ;;  %542 = vmatpush.msra.mxu1 %v127_v62  ;;  %v235_v40 = vld [vmem:[#allocation5 + $0x498] sm:$0xff]  ;;  %v297_v42 = vld [vmem:[#allocation5 + $0x688] sm:$0xff] }
  0x75   :  { %564 = vmatpush.msra.mxu2 %v155_v63  ;;  %583 = vmatpush.msra.mxu3 %v189_v0  ;;  %v331_v43 = vld [vmem:[#allocation5 + $0x798] sm:$0xff]  ;;  %v233_v44 = vld [vmem:[#allocation5 + $0x488] sm:$0xff] }
  0x76   :  { %524 = vmatpush.msra.mxu0 %v91_v3  ;;  %543 = vmatpush.msra.mxu1 %v125_v4  ;;  %v267_v45 = vld [vmem:[#allocation5 + $0x598] sm:$0xff]  ;;  %v329_v47 = vld [vmem:[#allocation5 + $0x788] sm:$0xff] }
  0x77   :  { %565 = vmatpush.msra.mxu2 %v153_v5  ;;  %584 = vmatpush.msra.mxu3 %v187_v6  ;;  %v295_v46 = vld [vmem:[#allocation5 + $0x678] sm:$0xff]  ;;  %v265_v49 = vld [vmem:[#allocation5 + $0x588] sm:$0xff] }
  0x78   :  { %525 = vmatpush.msra.mxu0 %v89_v9  ;;  %544 = vmatpush.msra.mxu1 %v123_v10  ;;  %v231_v48 = vld [vmem:[#allocation5 + $0x478] sm:$0xff]  ;;  %v293_v50 = vld [vmem:[#allocation5 + $0x668] sm:$0xff] }
  0x79   :  { %630 = vmatpush.msrb.mxu2 %v311_v7  ;;  %585 = vmatpush.msra.mxu3 %v185_v11  ;;  %v327_v51 = vld [vmem:[#allocation5 + $0x778] sm:$0xff]  ;;  %v229_v52 = vld [vmem:[#allocation5 + $0x468] sm:$0xff] }
  0x7a   :  { %590 = vmatpush.msrb.mxu0 %v247_v12  ;;  %545 = vmatpush.msra.mxu1 %v121_v15  ;;  %v263_v53 = vld [vmem:[#allocation5 + $0x578] sm:$0xff]  ;;  %v325_v55 = vld [vmem:[#allocation5 + $0x768] sm:$0xff] }
  0x7b   :  { %631 = vmatpush.msrb.mxu2 %v309_v13  ;;  %650 = vmatpush.msrb.mxu3 %v343_v14  ;;  %v291_v54 = vld [vmem:[#allocation5 + $0x658] sm:$0xff]  ;;  %v261_v57 = vld [vmem:[#allocation5 + $0x568] sm:$0xff] }
  0x7c   :  { %591 = vmatpush.msrb.mxu0 %v245_v17  ;;  %610 = vmatpush.msrb.mxu1 %v279_v18  ;;  %v227_v56 = vld [vmem:[#allocation5 + $0x458] sm:$0xff]  ;;  %v289_v58 = vld [vmem:[#allocation5 + $0x648] sm:$0xff] }
  0x7d   :  { %632 = vmatpush.msrb.mxu2 %v307_v19  ;;  %651 = vmatpush.msrb.mxu3 %v341_v20  ;;  %v323_v59 = vld [vmem:[#allocation5 + $0x758] sm:$0xff]  ;;  %v225_v61 = vld [vmem:[#allocation5 + $0x448] sm:$0xff] }
  0x7e   :  { %592 = vmatpush.msrb.mxu0 %v243_v23  ;;  %611 = vmatpush.msrb.mxu1 %v277_v24  ;;  %v259_v62 = vld [vmem:[#allocation5 + $0x558] sm:$0xff]  ;;  %v321_v0 = vld [vmem:[#allocation5 + $0x748] sm:$0xff] }
  0x7f   :  { %633 = vmatpush.msrb.mxu2 %v305_v25  ;;  %652 = vmatpush.msrb.mxu3 %v339_v26  ;;  %v287_v63 = vld [vmem:[#allocation5 + $0x638] sm:$0xff]  ;;  %v257_v4 = vld [vmem:[#allocation5 + $0x548] sm:$0xff] }
  0x80   :  { %593 = vmatpush.msrb.mxu0 %v241_v28  ;;  %612 = vmatpush.msrb.mxu1 %v275_v29  ;;  %v223_v3 = vld [vmem:[#allocation5 + $0x438] sm:$0xff]  ;;  %v285_v5 = vld [vmem:[#allocation5 + $0x628] sm:$0xff] }
  0x81   :  { %634 = vmatpush.msrb.mxu2 %v303_v30  ;;  %653 = vmatpush.msrb.mxu3 %v337_v31  ;;  %v319_v6 = vld [vmem:[#allocation5 + $0x738] sm:$0xff]  ;;  %v221_v7 = vld [vmem:[#allocation5 + $0x428] sm:$0xff] }
  0x82   :  { %594 = vmatpush.msrb.mxu0 %v239_v32  ;;  %613 = vmatpush.msrb.mxu1 %v273_v33  ;;  %v255_v9 = vld [vmem:[#allocation5 + $0x538] sm:$0xff]  ;;  %v317_v11 = vld [vmem:[#allocation5 + $0x728] sm:$0xff] }
  0x83   :  { %635 = vmatpush.msrb.mxu2 %v301_v34  ;;  %654 = vmatpush.msrb.mxu3 %v335_v35  ;;  %v283_v10 = vld [vmem:[#allocation5 + $0x618] sm:$0xff]  ;;  %v253_v12 = vld [vmem:[#allocation5 + $0x528] sm:$0xff]  ;;  %v344_v35 = vld [vmem:[#allocation7] sm:$0x3] }
  0x84   :  { %595 = vmatpush.msrb.mxu0 %v237_v36  ;;  %614 = vmatpush.msrb.mxu1 %v271_v37  ;;  %v281_v13 = vld [vmem:[#allocation5 + $0x608] sm:$0xff]  ;;  %v315_v14 = vld [vmem:[#allocation5 + $0x718] sm:$0xff] }
  0x85   :  { %636 = vmatpush.msrb.mxu2 %v299_v38  ;;  %655 = vmatpush.msrb.mxu3 %v333_v39  ;;  %v313_v15 = vld [vmem:[#allocation5 + $0x708] sm:$0xff]  ;;  %v686_v18 = vld [vmem:[#allocation8 + $0x70] sm:$0xff]  ;;  %v683_v23 = vld [vmem:[#allocation8 + $0x58] sm:$0xff]  ;;  %v346_v38 = vperm.slane %v344_v35, 0 }
  0x86   :  { %596 = vmatpush.msrb.mxu0 %v235_v40  ;;  %615 = vmatpush.msrb.mxu1 %v269_v41  ;;  %v249_v17 = vld [vmem:[#allocation5 + $0x508] sm:$0xff]  ;;  %v675_v28 = vld [vmem:[#allocation8 + $0x18] sm:$0xff]  ;;  %v674_v29 = vld [vmem:[#allocation8 + $0x10] sm:$0xff] }
  0x87   :  { %637 = vmatpush.msrb.mxu2 %v297_v42  ;;  %656 = vmatpush.msrb.mxu3 %v331_v43  ;;  %v685_v19 = vld [vmem:[#allocation8 + $0x68] sm:$0xff]  ;;  %v684_v20 = vld [vmem:[#allocation8 + $0x60] sm:$0xff]  ;;  %v703_v32 = vld [vmem:[#allocation8 + $0xf8] sm:$0xff] }
  0x88   :  { %597 = vmatpush.msrb.mxu0 %v233_v44  ;;  %616 = vmatpush.msrb.mxu1 %v267_v45  ;;  %v681_v24 = vld [vmem:[#allocation8 + $0x48] sm:$0xff]  ;;  %v680_v25 = vld [vmem:[#allocation8 + $0x40] sm:$0xff]  ;;  %v702_v33 = vld [vmem:[#allocation8 + $0xf0] sm:$0xff] }
  0x89   :  { %638 = vmatpush.msrb.mxu2 %v295_v46  ;;  %657 = vmatpush.msrb.mxu3 %v329_v47  ;;  %v677_v26 = vld [vmem:[#allocation8 + $0x28] sm:$0xff]  ;;  %v672_v31 = vld [vmem:[#allocation8] sm:$0xff]  ;;  %v699_v37 = vld [vmem:[#allocation8 + $0xd8] sm:$0xff] }
  0x8a   :  { %598 = vmatpush.msrb.mxu0 %v231_v48  ;;  %617 = vmatpush.msrb.mxu1 %v265_v49  ;;  %v673_v30 = vld [vmem:[#allocation8 + $0x8] sm:$0xff]  ;;  %v700_v36 = vld [vmem:[#allocation8 + $0xe0] sm:$0xff]  ;;  %v698_v39 = vld [vmem:[#allocation8 + $0xd0] sm:$0xff] }
  0x8b   :  { %639 = vmatpush.msrb.mxu2 %v293_v50  ;;  %658 = vmatpush.msrb.mxu3 %v327_v51  ;;  %v701_v34 = vld [vmem:[#allocation8 + $0xe8] sm:$0xff] }
  0x8c   :  { %599 = vmatpush.msrb.mxu0 %v229_v52  ;;  %618 = vmatpush.msrb.mxu1 %v263_v53 }
  0x8d   :  { %640 = vmatpush.msrb.mxu2 %v291_v54  ;;  %659 = vmatpush.msrb.mxu3 %v325_v55 }
  0x8e   :  { %600 = vmatpush.msrb.mxu0 %v227_v56  ;;  %619 = vmatpush.msrb.mxu1 %v261_v57  ;;  %v697_v57 = vld [vmem:[#allocation8 + $0xc8] sm:$0xff] }
  0x8f   :  { %641 = vmatpush.msrb.mxu2 %v289_v58  ;;  %660 = vmatpush.msrb.mxu3 %v323_v59  ;;  %v696_v58 = vld [vmem:[#allocation8 + $0xc0] sm:$0xff]  ;;  %v695_v59 = vld [vmem:[#allocation8 + $0xb8] sm:$0xff] }
  0x90   :  { %566 = vmatmul.f32.vlgmr.msra.gmra.mxu2 %v957_v60  ;;  %601 = vmatpush.msrb.mxu0 %v225_v61  ;;  %v219_v60 = vld [vmem:[#allocation5 + $0x418] sm:$0xff] }
  0x91   :  { %620 = vmatpush.msrb.mxu1 %v259_v62  ;;  %642 = vmatpush.msrb.mxu2 %v287_v63  ;;  %v694_v61 = vld [vmem:[#allocation8 + $0xb0] sm:$0xff]  ;;  %v693_v62 = vld [vmem:[#allocation8 + $0xa8] sm:$0xff]  ;;  %v692_v63 = vld [vmem:[#allocation8 + $0xa0] sm:$0xff] }
  0x92   :  { %661 = vmatpush.msrb.mxu3 %v321_v0  ;;  %526 = vmatmul.f32.vlgmr.msra.gmra.mxu0 %v959_v1  ;;  %v217_v1 = vld [vmem:[#allocation5 + $0x408] sm:$0xff]  ;;  %v691_v0 = vld [vmem:[#allocation8 + $0x98] sm:$0xff] }
  0x93   :  { %586 = vmatmul.f32.vlgmr.msra.gmra.mxu3 %v962_v2  ;;  %602 = vmatpush.msrb.mxu0 %v223_v3  ;;  %v251_v2 = vld [vmem:[#allocation5 + $0x518] sm:$0xff] }
  0x94   :  { %621 = vmatpush.msrb.mxu1 %v257_v4  ;;  %643 = vmatpush.msrb.mxu2 %v285_v5  ;;  %v690_v3 = vld [vmem:[#allocation8 + $0x90] sm:$0xff]  ;;  %v689_v4 = vld [vmem:[#allocation8 + $0x88] sm:$0xff]  ;;  %v688_v5 = vld [vmem:[#allocation8 + $0x80] sm:$0xff] }
  0x95   :  { %662 = vmatpush.msrb.mxu3 %v319_v6  ;;  %546 = vmatmul.f32.vlgmr.msra.gmra.mxu1 %v966_v8  ;;  %v687_v8 = vld [vmem:[#allocation8 + $0x78] sm:$0xff]  ;;  %v347_v6 = vperm.slane %v344_v35, 1 }
  0x96   :  { %603 = vmatpush.msrb.mxu0 %v221_v7  ;;  %622 = vmatpush.msrb.mxu1 %v255_v9 }
  0x97   :  { %644 = vmatpush.msrb.mxu2 %v283_v10  ;;  %663 = vmatpush.msrb.mxu3 %v317_v11 }
  0x98   :  { %604 = vmatpush.msrb.mxu0 %v219_v60  ;;  %623 = vmatpush.msrb.mxu1 %v253_v12 }
  0x99   :  { %645 = vmatpush.msrb.mxu2 %v281_v13  ;;  %664 = vmatpush.msrb.mxu3 %v315_v14 }
  0x9a   :  { %646 = vmatmul.f32.vlgmr.msrb.gmra.mxu2 %v969_v16  ;;  %605 = vmatpush.msrb.mxu0 %v217_v1  ;;  %v682_v16 = vld [vmem:[#allocation8 + $0x50] sm:$0xff] }
  0x9b   :  { %624 = vmatpush.msrb.mxu1 %v251_v2  ;;  %665 = vmatpush.msrb.mxu3 %v313_v15 }
  0x9c   :  { %606 = vmatmul.f32.vlgmr.msrb.gmra.mxu0 %v971_v21  ;;  %666 = vmatmul.f32.vlgmr.msrb.gmra.mxu3 %v974_v22  ;;  %v679_v21 = vld [vmem:[#allocation8 + $0x38] sm:$0xff]  ;;  %v678_v22 = vld [vmem:[#allocation8 + $0x30] sm:$0xff] }
  0x9d   :  { %625 = vmatpush.msrb.mxu1 %v249_v17  ;;  %708 = vmatpush.msra.mxu0 %v687_v8 }
  0x9e   :  { %626 = vmatmul.f32.vlgmr.msrb.gmra.mxu1 %v977_v27  ;;  %v676_v27 = vld [vmem:[#allocation8 + $0x20] sm:$0xff] }
  0x9f   :  { %709 = vmatpush.msra.mxu0 %v686_v18  ;;  %728 = vmatpush.msra.mxu1 %v703_v32 }
  0xa1   :  { %710 = vmatpush.msra.mxu0 %v685_v19  ;;  %729 = vmatpush.msra.mxu1 %v702_v33 }
  0xa3   :  { %711 = vmatpush.msra.mxu0 %v684_v20  ;;  %730 = vmatpush.msra.mxu1 %v701_v34 }
  0xa5   :  { %712 = vmatpush.msra.mxu0 %v683_v23  ;;  %731 = vmatpush.msra.mxu1 %v700_v36 }
  0xa7   :  { %713 = vmatpush.msra.mxu0 %v682_v16  ;;  %732 = vmatpush.msra.mxu1 %v699_v37  ;;  %v777_v16 = vld [vmem:[%s999_s4] ss:$0 sm:$0xff] }
  0xa9   :  { %714 = vmatpush.msra.mxu0 %v681_v24  ;;  %733 = vmatpush.msra.mxu1 %v698_v39 }
  0xab   :  { %715 = vmatpush.msra.mxu0 %v680_v25  ;;  %734 = vmatpush.msra.mxu1 %v697_v57 }
  0xad   :  { %716 = vmatpush.msra.mxu0 %v679_v21  ;;  %735 = vmatpush.msra.mxu1 %v696_v58 }
  0xaf   :  { %717 = vmatpush.msra.mxu0 %v678_v22  ;;  %736 = vmatpush.msra.mxu1 %v695_v59 }
  0xb1   :  { %718 = vmatpush.msra.mxu0 %v677_v26  ;;  %737 = vmatpush.msra.mxu1 %v694_v61 }
  0xb3   :  { %719 = vmatpush.msra.mxu0 %v676_v27  ;;  %738 = vmatpush.msra.mxu1 %v693_v62 }
  0xb5   :  { %720 = vmatpush.msra.mxu0 %v675_v28  ;;  %739 = vmatpush.msra.mxu1 %v692_v63 }
  0xb7   :  { %721 = vmatpush.msra.mxu0 %v674_v29  ;;  %740 = vmatpush.msra.mxu1 %v691_v0 }
  0xb9   :  { %722 = vmatpush.msra.mxu0 %v673_v30  ;;  %741 = vmatpush.msra.mxu1 %v690_v3 }
  0xbb   :  { %723 = vmatpush.msra.mxu0 %v672_v31  ;;  %742 = vmatpush.msra.mxu1 %v689_v4 }
  0xbd   :  { %743 = vmatpush.msra.mxu1 %v688_v5 }
  0xd3   :  { %v367_v40 = vpop.f32.mrf.mxu0 }
  0xd4   :  { %v368_v41 = vadd.f32 %v367_v40, %v346_v38 }
  0xd7   :  { %v387_v42 = vpop.f32.mrf.mxu1  ;;  %v407_v43 = vpop.f32.mrf.mxu2 }
  0xd8   :  { %v388_v44 = vadd.f32 %v387_v42, %v368_v41 }
  0xda   :  { %v408_v45 = vadd.f32 %v407_v43, %v388_v44  ;;  %v427_v46 = vpop.f32.mrf.mxu3 }
  0xdc   :  { %v428_v47 = vadd.f32 %v427_v46, %v408_v45 }
  0xdd   :  { %v447_v48 = vpop.f32.mrf.mxu0 }
  0xde   :  { %v448_v49 = vadd.f32 %v447_v48, %v428_v47 }
  0xe0   :  { %v467_v50 = vpop.f32.mrf.mxu1 }
  0xe1   :  { %v468_v51 = vadd.f32 %v467_v50, %v448_v49  ;;  %v487_v52 = vpop.f32.mrf.mxu2 }
  0xe3   :  { %v488_v53 = vadd.f32 %v487_v52, %v468_v51 }
  0xe4   :  { %v507_v54 = vpop.f32.mrf.mxu3 }
  0xe5   :  { %v508_v55 = vadd.f32 %v507_v54, %v488_v53 }
  0xe7   :  { %v670_v56 = vmax.f32 %v508_v55, 0.0 }
  0xe9   :  { %724 = vmatmul.f32.vlgmr.msra.gmra.mxu0 %v670_v56 }
 0x10f   :  { %v527_v7 = vpop.f32.mrf.mxu0 }
 0x110   :  { %v528_v9 = vadd.f32 %v527_v7, %v347_v6 }
 0x112   :  { %v547_v10 = vpop.f32.mrf.mxu1 }
 0x113   :  { %v548_v11 = vadd.f32 %v547_v10, %v528_v9  ;;  %v567_v60 = vpop.f32.mrf.mxu2 }
 0x115   :  { %v568_v12 = vadd.f32 %v567_v60, %v548_v11 }
 0x116   :  { %v587_v13 = vpop.f32.mrf.mxu3 }
 0x117   :  { %v588_v14 = vadd.f32 %v587_v13, %v568_v12 }
 0x119   :  { %v607_v1 = vpop.f32.mrf.mxu0 }
 0x11a   :  { %v608_v2 = vadd.f32 %v607_v1, %v588_v14 }
 0x11b   :  { %v627_v15 = vpop.f32.mrf.mxu1 }
 0x11c   :  { %v628_v17 = vadd.f32 %v627_v15, %v608_v2 }
 0x11d   :  { %v647_v8 = vpop.f32.mrf.mxu2 }
 0x11e   :  { %v648_v18 = vadd.f32 %v647_v8, %v628_v17 }
 0x11f   :  { %v667_v19 = vpop.f32.mrf.mxu3 }
 0x120   :  { %v668_v20 = vadd.f32 %v667_v19, %v648_v18 }
 0x122   :  { %v671_v23 = vmax.f32 %v668_v20, 0.0 }
 0x124   :  { %744 = vmatmul.f32.vlgmr.msra.gmra.mxu1 %v671_v23 }
 0x166   :  { %v725_v24 = vpop.f32.mrf.mxu0 }
 0x167   :  { %v726_v25 = vadd.f32 %v777_v16, %v725_v24 }
 0x1a1   :  { %v745_v21 = vpop.f32.mrf.mxu1 }
 0x1a2   :  { %v746_v22 = vadd.f32 %v745_v21, %v726_v25 }
 0x1a4   :  { %748 = vst [vmem:[#allocation10] sm:$0xff] %v746_v22 }
 0x1a5   :  { %759 = dma.vmem_to_hbm [thread:$0]  %s755_s16, 128, %s757_s19, [#allocation4]  }
 0x1a6   :  { %904 = dma.done.wait [#allocation4], 128  }
 0x1a7   :  { %905 = vsyncadd [#allocation4], 4294967168 }
 0x1a8   :  { %764 = vsyncpa [#allocation3], 1 }
 0x1a9   :  { %765 = vsyncpa [#allocation6], 1 }
 0x1aa   :  { %766 = vsyncpa [#allocation9], 1 }
 0x1ab   :  { %767 = vsyncpa [#allocation4], 1 }

</bundles_post_ra>
